<compile_context>
chip_gen: v7x
topology: tpu7x:2x2x1
jax: 0.10.0
libtpu: 0.0.40
codegen_flags: <defaults>
</compile_context>

<pallas_src>
import jax
import jax.numpy as jnp
from jax.experimental import pallas as pl
from jax.experimental.pallas import tpu as pltpu


# ----------------------------- Pallas kernel --------------------------------
def _cdan_disc_kernel(x_ref, w1_ref, b1_ref, w2_ref, b2_ref, w3_ref, b3_ref,
                      o_ref, h1_acc_ref):
    """relu(relu(x@W1+b1)@W2+b2)@W3+b3 on one (TB, *) batch tile.

    Grid = (batch_steps, k_steps); layer-1 contraction is accumulated over the
    inner k axis into an f32 VMEM scratch, layers 2/3 + store run on the last
    k step only.
    """
    k = pl.program_id(1)
    nk = pl.num_programs(1)

    @pl.when(k == 0)
    def _init():
        h1_acc_ref[...] = jnp.zeros_like(h1_acc_ref)

    # Layer 1 partial product (MXU, f32 accumulate).
    h1_acc_ref[...] += jnp.dot(x_ref[...], w1_ref[...],
                               preferred_element_type=jnp.float32)

    @pl.when(k == nk - 1)
    def _finalize():
        h1 = jnp.maximum(h1_acc_ref[...] + b1_ref[...], 0.0)
        h2 = jnp.dot(h1.astype(w2_ref.dtype), w2_ref[...],
                     preferred_element_type=jnp.float32)
        h2 = jnp.maximum(h2 + b2_ref[...], 0.0)
        out = jnp.dot(h2.astype(w3_ref.dtype), w3_ref[...],
                      preferred_element_type=jnp.float32)
        o_ref[...] = (out + b3_ref[...]).astype(o_ref.dtype)


# ------------------------------- helpers -------------------------------------
def _round_up(n, m):
    return ((n + m - 1) // m) * m


def _pad2d(a, rows, cols):
    r, c = a.shape
    if r == rows and c == cols:
        return a
    return jnp.pad(a, ((0, rows - r), (0, cols - c)))


def _vmem_capacity_bytes():
    try:
        return int(pltpu.get_tpu_info().vmem_capacity_bytes)
    except Exception:
        return 64 << 20   # conservative fallback (legal on v7x too)


# ------------------------------- wrapper --------------------------------------
def discriminator_cdan_forward(x, params, *, block_batch=512,
                               compute_dtype=jnp.bfloat16):
    """Fused discriminator MLP with a batch-parallel (+ layer-1 K) Pallas grid.

    x      : (B, Din)
    params : (w1 (Din,H), b1 (1,H), w2 (H,H), b2 (1,H), w3 (H,2), b3 (1,2))
             weights stored as (in, out), i.e. transposed vs. PyTorch.
    """
    w1, b1, w2, b2, w3, b3 = params
    B, Din = x.shape
    H = w1.shape[1]
    Dout = w3.shape[1]
    out_dtype = x.dtype

    LANE = 128
    itemsize = jnp.dtype(compute_dtype).itemsize
    SUB = (8 * 4) // itemsize            # 8 rows for f32 tiles, 16 for bf16

    H_p = _round_up(H, LANE)
    Dout_p = _round_up(Dout, LANE)       # 2 -> 128: lane-dense unmasked store

    # --- generation-aware VMEM budget (~80% of physical/scoped capacity) ----
    vmem_budget = int(_vmem_capacity_bytes() * 0.8)

    # --- batch tile: large by default, but >=2 grid steps when possible so
    #     dimension_semantics=("parallel",...) can use both v7x TensorCores ---
    B_sub = _round_up(B, SUB)
    TB = min(B_sub, _round_up(block_batch, SUB))
    if B_sub // TB < 2 and B_sub >= 2 * SUB:
        TB = _round_up(B_sub // 2, SUB)

    # --- layer-1 K split: keep W1 resident when it fits, else stream it ------
    resident_fixed = (itemsize * (H_p * H_p + H_p * Dout_p)
                      + 4 * (2 * H_p + Dout_p))
    w1_bytes = itemsize * Din * H_p
    w1_budget = max(vmem_budget // 2, vmem_budget - resident_fixed - (8 << 20))
    if w1_bytes <= w1_budget:
        k_steps, TK, Din_p, w1_resident = 1, Din, Din, True
    else:
        TK = max(LANE, ((w1_budget // (2 * itemsize * H_p)) // LANE) * LANE)
        Din_p = _round_up(Din, TK)
        k_steps = Din_p // TK
        w1_resident = False

    # --- tightened VMEM estimate (weights x buf-count, x/out x2, f32 temps) --
    def _vmem_est(tb):
        wbuf = 2   # conservative: assume double buffering even if Buffered(1)
        w1_vmem = (wbuf * w1_bytes) if w1_resident else (2 * itemsize * TK * H_p)
        return (w1_vmem
                + wbuf * resident_fixed
                + 2 * itemsize * tb * TK           # x tiles
                + 2 * itemsize * tb * Dout_p       # out tiles
                + 4 * tb * H_p                     # h1 f32 accumulator scratch
                + 4 * tb * (H_p + Dout_p))         # live h2 / logits temporaries

    while TB > SUB and _vmem_est(TB) > vmem_budget:
        TB = max(SUB, _round_up(TB // 2, SUB))
    B_p = _round_up(B, TB)
    vmem_limit = int(min(vmem_budget, max(2 * _vmem_est(TB), 32 << 20)))

    # --- pad + cast operands (zero padding is exact through Linear+ReLU).
    #     When k_steps == 1, Din is left un-padded -> no extra HBM pass just
    #     to lane-pad the activations. Batch pad (if any) fuses with the cast.
    xp = x
    if (B_p, Din_p) != (B, Din):
        xp = jnp.pad(xp, ((0, B_p - B), (0, Din_p - Din)))
    xp = xp.astype(compute_dtype)
    w1p = _pad2d(w1, Din_p, H_p).astype(compute_dtype)
    w2p = _pad2d(w2, H_p, H_p).astype(compute_dtype)
    w3p = _pad2d(w3, H_p, Dout_p).astype(compute_dtype)
    b1p = _pad2d(b1, 1, H_p).astype(jnp.float32)   # biases stay f32 (f32 acc)
    b2p = _pad2d(b2, 1, H_p).astype(jnp.float32)
    b3p = _pad2d(b3, 1, Dout_p).astype(jnp.float32)

    grid = (B_p // TB, k_steps)

    flops = 2 * B_p * (Din_p * H_p + H_p * H_p + H_p * Dout_p)
    bytes_accessed = int(
        itemsize * (B_p * Din_p + Din_p * H_p + H_p * H_p + H_p * Dout_p
                    + B_p * Dout_p)
        + 4 * (2 * H_p + Dout_p))

    def _run(single_buffer):
        def wspec(shape, index_map):
            # Resident (never re-DMA'd) operands: single-buffer to halve their
            # VMEM footprint; fall back silently if this build rejects it.
            if single_buffer:
                return pl.BlockSpec(shape, index_map,
                                    pipeline_mode=pl.Buffered(1))
            return pl.BlockSpec(shape, index_map)

        if w1_resident:
            w1_spec = wspec((TK, H_p), lambda i, k: (0, 0))
        else:
            w1_spec = pl.BlockSpec((TK, H_p), lambda i, k: (k, 0))

        in_specs = [
            pl.BlockSpec((TB, TK), lambda i, k: (i, k)),      # x tile
            w1_spec,                                          # W1
            wspec((1, H_p), lambda i, k: (0, 0)),             # b1
            wspec((H_p, H_p), lambda i, k: (0, 0)),           # W2
            wspec((1, H_p), lambda i, k: (0, 0)),             # b2
            wspec((H_p, Dout_p), lambda i, k: (0, 0)),        # W3
            wspec((1, Dout_p), lambda i, k: (0, 0)),          # b3
        ]

        return pl.pallas_call(
            _cdan_disc_kernel,
            out_shape=jax.ShapeDtypeStruct((B_p, Dout_p), compute_dtype),
            grid=grid,
            in_specs=in_specs,
            out_specs=pl.BlockSpec((TB, Dout_p), lambda i, k: (i, 0)),
            scratch_shapes=[pltpu.VMEM((TB, H_p), jnp.float32)],
            compiler_params=pltpu.CompilerParams(
                dimension_semantics=("parallel", "arbitrary"),
                vmem_limit_bytes=vmem_limit),
            cost_estimate=pl.CostEstimate(
                flops=flops, transcendentals=0,
                bytes_accessed=bytes_accessed),
        )(xp, w1p, b1p, w2p, b2p, w3p, b3p)

    try:
        out_padded = _run(single_buffer=True)
    except Exception:
        # pipeline_mode=pl.Buffered(1) unsupported on this build -> default.
        out_padded = _run(single_buffer=False)

    # Strip batch / lane padding and restore the caller's dtype (wrapper-side
    # layout plumbing, not compute).
    return out_padded[:B, :Dout].astype(out_dtype)


# --------------------------- parameter creation ------------------------------
def init_params(key, in_features, hid_dim, out_features=2):
    """PyTorch-nn.Linear-style init; weights stored as (in, out) = W^T."""
    def linear(key, fan_in, fan_out):
        kw, kb = jax.random.split(key)
        bound = 1.0 / (fan_in ** 0.5)
        w = jax.random.uniform(kw, (fan_in, fan_out), jnp.float32,
                               minval=-bound, maxval=bound)
        b = jax.random.uniform(kb, (1, fan_out), jnp.float32,
                               minval=-bound, maxval=bound)
        return w, b

    k1, k2, k3 = jax.random.split(key, 3)
    w1, b1 = linear(k1, in_features, hid_dim)
    w2, b2 = linear(k2, hid_dim, hid_dim)
    w3, b3 = linear(k3, hid_dim, out_features)
    return (w1, b1, w2, b2, w3, b3)


# ------------------------------ reference ------------------------------------
def reference_forward(x, params, compute_dtype=jnp.float32):
    """Pure-JAX reference that mirrors the kernel's dtype path exactly."""
    w1, b1, w2, b2, w3, b3 = params
    cd = compute_dtype
    hp = jax.lax.Precision.HIGHEST
    h1 = jnp.dot(x.astype(cd), w1.astype(cd), precision=hp,
                 preferred_element_type=jnp.float32)
    h1 = jnp.maximum(h1 + b1, 0.0)
    h2 = jnp.dot(h1.astype(cd), w2.astype(cd), precision=hp,
                 preferred_element_type=jnp.float32)
    h2 = jnp.maximum(h2 + b2, 0.0)
    out = jnp.dot(h2.astype(cd), w3.astype(cd), precision=hp,
                  preferred_element_type=jnp.float32)
    out = (out + b3).astype(cd)
    return out.astype(x.dtype)


# --------------------------------- main ---------------------------------------
if __name__ == "__main__":
    # Small synthetic "configs": features_len=2, out_dim=4, num_classes=4
    #   -> in_features = 2*4*4 = 32 ; disc_hid_dim = 32 ; 2 output logits.
    features_len, out_dim, num_classes = 2, 4, 4
    disc_hid_dim = 32
    in_features = features_len * out_dim * num_classes
    key = jax.random.PRNGKey(0)
    kx, kp, kx2 = jax.random.split(key, 3)

    params = init_params(kp, in_features, disc_hid_dim, out_features=2)

    # Check 1: default bf16 path, tiny batch (single grid step).
    x = jax.random.normal(kx, (2, in_features), jnp.float32)
    out = jax.block_until_ready(discriminator_cdan_forward(x, params))
    ref = reference_forward(x, params, compute_dtype=jnp.bfloat16)
    assert out.shape == (2, 2)
    assert jnp.allclose(out, ref, atol=1e-2, rtol=1e-2)

    # Check 2: bf16, odd batch -> multi-step parallel batch grid + batch pad.
    x2 = jax.random.normal(kx2, (20, in_features), jnp.float32)
    out2 = jax.block_until_ready(discriminator_cdan_forward(x2, params))
    ref2 = reference_forward(x2, params, compute_dtype=jnp.bfloat16)
    assert out2.shape == (20, 2)
    assert jnp.allclose(out2, ref2, atol=1e-2, rtol=1e-2)

    # Check 3: exact-parity f32 path with a small batch tile (3 grid steps).
    out3 = jax.block_until_ready(
        discriminator_cdan_forward(x2, params, block_batch=8,
                                   compute_dtype=jnp.float32))
    ref3 = reference_forward(x2, params, compute_dtype=jnp.float32)
    assert jnp.allclose(out3, ref3, atol=1e-4, rtol=1e-4)

    print("KERNEL_OK")
</pallas_src>

<mosaic_0001>
module attributes {stable_mosaic.version = 11 : i64} {
  func.func @_cdan_disc_kernel(%arg0: i32, %arg1: i32, %arg2: memref<16x32xbf16, #tpu.memory_space<vmem>>, %arg3: memref<32x128xbf16, #tpu.memory_space<vmem>>, %arg4: memref<1x128xf32, #tpu.memory_space<vmem>>, %arg5: memref<128x128xbf16, #tpu.memory_space<vmem>>, %arg6: memref<1x128xf32, #tpu.memory_space<vmem>>, %arg7: memref<128x128xbf16, #tpu.memory_space<vmem>>, %arg8: memref<1x128xf32, #tpu.memory_space<vmem>>, %arg9: memref<16x128xbf16, #tpu.memory_space<vmem>>, %arg10: memref<16x128xf32, #tpu.memory_space<vmem>>) attributes {dimension_semantics = [#tpu.dimension_semantics<parallel>, #tpu.dimension_semantics<arbitrary>], iteration_bounds = array<i64: 1, 1>, scalar_prefetch = 0 : i64, scratch_operands = 1 : i64, tpu.core_type = #tpu.core_type<tc>, window_params = [{transform_indices = @transform_0, window_bounds = array<i64: 16, 32>}, {pipeline_mode = #tpu.pipeline_mode<synchronous>, transform_indices = @transform_1, window_bounds = array<i64: 32, 128>}, {pipeline_mode = #tpu.pipeline_mode<synchronous>, transform_indices = @transform_2, window_bounds = array<i64: 1, 128>}, {pipeline_mode = #tpu.pipeline_mode<synchronous>, transform_indices = @transform_3, window_bounds = array<i64: 128, 128>}, {pipeline_mode = #tpu.pipeline_mode<synchronous>, transform_indices = @transform_4, window_bounds = array<i64: 1, 128>}, {pipeline_mode = #tpu.pipeline_mode<synchronous>, transform_indices = @transform_5, window_bounds = array<i64: 128, 128>}, {pipeline_mode = #tpu.pipeline_mode<synchronous>, transform_indices = @transform_6, window_bounds = array<i64: 1, 128>}, {transform_indices = @transform_7, window_bounds = array<i64: 16, 128>}]} {
    %c0_i32 = arith.constant 0 : i32
    %0 = arith.cmpi eq, %arg1, %c0_i32 : i32
    %1 = arith.extui %0 : i1 to i32
    %c0_i32_0 = arith.constant 0 : i32
    %2 = arith.cmpi ne, %1, %c0_i32_0 : i32
    scf.if %2 {
      %cst_10 = arith.constant 0.000000e+00 : f32
      %12 = vector.broadcast %cst_10 : f32 to vector<16x128xf32>
      %c0_11 = arith.constant 0 : index
      %c0_12 = arith.constant 0 : index
      %13 = vector.load %arg10[%c0_11, %c0_12] : memref<16x128xf32, #tpu.memory_space<vmem>>, vector<16x128xf32>
      tpu.vector_store %arg10[%c0_11, %c0_12], %12 {strides = array<i32>} : memref<16x128xf32, #tpu.memory_space<vmem>>, vector<16x128xf32>,
    } else {
    }
    %c0 = arith.constant 0 : index
    %c0_1 = arith.constant 0 : index
    %3 = vector.load %arg10[%c0, %c0_1] : memref<16x128xf32, #tpu.memory_space<vmem>>, vector<16x128xf32>
    %c0_2 = arith.constant 0 : index
    %c0_3 = arith.constant 0 : index
    %4 = vector.load %arg2[%c0_2, %c0_3] : memref<16x32xbf16, #tpu.memory_space<vmem>>, vector<16x32xbf16>
    %c0_4 = arith.constant 0 : index
    %c0_5 = arith.constant 0 : index
    %5 = vector.load %arg3[%c0_4, %c0_5] : memref<32x128xbf16, #tpu.memory_space<vmem>>, vector<32x128xbf16>
    %cst = arith.constant dense<0.000000e+00> : vector<16x128xf32>
    %6 = tpu.matmul %4, %5, %cst {dimension_numbers = #tpu.dot_dimension_numbers<[1], [0], [0], [1], [0, 0, 1, 1], [], []>} : vector<16x32xbf16>, vector<32x128xbf16>, vector<16x128xf32> -> vector<16x128xf32>
    %7 = arith.addf %3, %6 : vector<16x128xf32>
    %c0_6 = arith.constant 0 : index
    %c0_7 = arith.constant 0 : index
    %8 = vector.load %arg10[%c0_6, %c0_7] : memref<16x128xf32, #tpu.memory_space<vmem>>, vector<16x128xf32>
    tpu.vector_store %arg10[%c0_6, %c0_7], %7 {strides = array<i32>} : memref<16x128xf32, #tpu.memory_space<vmem>>, vector<16x128xf32>,
    %c0_i32_8 = arith.constant 0 : i32
    %9 = arith.cmpi eq, %arg1, %c0_i32_8 : i32
    %10 = arith.extui %9 : i1 to i32
    %c0_i32_9 = arith.constant 0 : i32
    %11 = arith.cmpi ne, %10, %c0_i32_9 : i32
    scf.if %11 {
      %c0_10 = arith.constant 0 : index
      %c0_11 = arith.constant 0 : index
      %12 = vector.load %arg10[%c0_10, %c0_11] : memref<16x128xf32, #tpu.memory_space<vmem>>, vector<16x128xf32>
      %c0_12 = arith.constant 0 : index
      %c0_13 = arith.constant 0 : index
      %13 = vector.load %arg4[%c0_12, %c0_13] : memref<1x128xf32, #tpu.memory_space<vmem>>, vector<1x128xf32>
      %14 = vector.broadcast %13 : vector<1x128xf32> to vector<16x128xf32>
      %15 = arith.addf %12, %14 : vector<16x128xf32>
      %cst_14 = arith.constant 0.000000e+00 : f32
      %16 = vector.broadcast %cst_14 : f32 to vector<16x128xf32>
      %17 = arith.maximumf %15, %16 : vector<16x128xf32>
      %18 = arith.truncf %17 : vector<16x128xf32> to vector<16x128xbf16>
      %c0_15 = arith.constant 0 : index
      %c0_16 = arith.constant 0 : index
      %19 = vector.load %arg5[%c0_15, %c0_16] : memref<128x128xbf16, #tpu.memory_space<vmem>>, vector<128x128xbf16>
      %cst_17 = arith.constant dense<0.000000e+00> : vector<16x128xf32>
      %20 = tpu.matmul %18, %19, %cst_17 {dimension_numbers = #tpu.dot_dimension_numbers<[1], [0], [0], [1], [0, 0, 1, 1], [], []>} : vector<16x128xbf16>, vector<128x128xbf16>, vector<16x128xf32> -> vector<16x128xf32>
      %c0_18 = arith.constant 0 : index
      %c0_19 = arith.constant 0 : index
      %21 = vector.load %arg6[%c0_18, %c0_19] : memref<1x128xf32, #tpu.memory_space<vmem>>, vector<1x128xf32>
      %22 = vector.broadcast %21 : vector<1x128xf32> to vector<16x128xf32>
      %23 = arith.addf %20, %22 : vector<16x128xf32>
      %cst_20 = arith.constant 0.000000e+00 : f32
      %24 = vector.broadcast %cst_20 : f32 to vector<16x128xf32>
      %25 = arith.maximumf %23, %24 : vector<16x128xf32>
      %26 = arith.truncf %25 : vector<16x128xf32> to vector<16x128xbf16>
      %c0_21 = arith.constant 0 : index
      %c0_22 = arith.constant 0 : index
      %27 = vector.load %arg7[%c0_21, %c0_22] : memref<128x128xbf16, #tpu.memory_space<vmem>>, vector<128x128xbf16>
      %cst_23 = arith.constant dense<0.000000e+00> : vector<16x128xf32>
      %28 = tpu.matmul %26, %27, %cst_23 {dimension_numbers = #tpu.dot_dimension_numbers<[1], [0], [0], [1], [0, 0, 1, 1], [], []>} : vector<16x128xbf16>, vector<128x128xbf16>, vector<16x128xf32> -> vector<16x128xf32>
      %c0_24 = arith.constant 0 : index
      %c0_25 = arith.constant 0 : index
      %29 = vector.load %arg8[%c0_24, %c0_25] : memref<1x128xf32, #tpu.memory_space<vmem>>, vector<1x128xf32>
      %30 = vector.broadcast %29 : vector<1x128xf32> to vector<16x128xf32>
      %31 = arith.addf %28, %30 : vector<16x128xf32>
      %32 = arith.truncf %31 : vector<16x128xf32> to vector<16x128xbf16>
      %c0_26 = arith.constant 0 : index
      %c0_27 = arith.constant 0 : index
      %33 = vector.load %arg9[%c0_26, %c0_27] : memref<16x128xbf16, #tpu.memory_space<vmem>>, vector<16x128xbf16>
      tpu.vector_store %arg9[%c0_26, %c0_27], %32 {strides = array<i32>} : memref<16x128xbf16, #tpu.memory_space<vmem>>, vector<16x128xbf16>,
    } else {
    }
    return
  }
  func.func @transform_0(%arg0: i32, %arg1: i32) -> (i32, i32) {
    %c0_i32 = arith.constant 0 : i32
    return %arg0, %arg1 : i32, i32
  }
  func.func @transform_1(%arg0: i32, %arg1: i32) -> (i32, i32) {
    %c0_i32 = arith.constant 0 : i32
    %c0_i32_0 = arith.constant 0 : i32
    %c0_i32_1 = arith.constant 0 : i32
    return %c0_i32, %c0_i32_0 : i32, i32
  }
  func.func @transform_2(%arg0: i32, %arg1: i32) -> (i32, i32) {
    %c0_i32 = arith.constant 0 : i32
    %c0_i32_0 = arith.constant 0 : i32
    %c0_i32_1 = arith.constant 0 : i32
    return %c0_i32, %c0_i32_0 : i32, i32
  }
  func.func @transform_3(%arg0: i32, %arg1: i32) -> (i32, i32) {
    %c0_i32 = arith.constant 0 : i32
    %c0_i32_0 = arith.constant 0 : i32
    %c0_i32_1 = arith.constant 0 : i32
    return %c0_i32, %c0_i32_0 : i32, i32
  }
  func.func @transform_4(%arg0: i32, %arg1: i32) -> (i32, i32) {
    %c0_i32 = arith.constant 0 : i32
    %c0_i32_0 = arith.constant 0 : i32
    %c0_i32_1 = arith.constant 0 : i32
    return %c0_i32, %c0_i32_0 : i32, i32
  }
  func.func @transform_5(%arg0: i32, %arg1: i32) -> (i32, i32) {
    %c0_i32 = arith.constant 0 : i32
    %c0_i32_0 = arith.constant 0 : i32
    %c0_i32_1 = arith.constant 0 : i32
    return %c0_i32, %c0_i32_0 : i32, i32
  }
  func.func @transform_6(%arg0: i32, %arg1: i32) -> (i32, i32) {
    %c0_i32 = arith.constant 0 : i32
    %c0_i32_0 = arith.constant 0 : i32
    %c0_i32_1 = arith.constant 0 : i32
    return %c0_i32, %c0_i32_0 : i32, i32
  }
  func.func @transform_7(%arg0: i32, %arg1: i32) -> (i32, i32) {
    %c0_i32 = arith.constant 0 : i32
    %c0_i32_0 = arith.constant 0 : i32
    return %arg0, %c0_i32 : i32, i32
  }
}

module attributes {stable_mosaic.version = 11 : i64} {
  func.func @_cdan_disc_kernel(%arg0: i32, %arg1: i32, %arg2: memref<16x32xbf16, #tpu.memory_space<vmem>>, %arg3: memref<32x128xbf16, #tpu.memory_space<vmem>>, %arg4: memref<1x128xf32, #tpu.memory_space<vmem>>, %arg5: memref<128x128xbf16, #tpu.memory_space<vmem>>, %arg6: memref<1x128xf32, #tpu.memory_space<vmem>>, %arg7: memref<128x128xbf16, #tpu.memory_space<vmem>>, %arg8: memref<1x128xf32, #tpu.memory_space<vmem>>, %arg9: memref<16x128xbf16, #tpu.memory_space<vmem>>, %arg10: memref<16x128xf32, #tpu.memory_space<vmem>>) attributes {dimension_semantics = [#tpu.dimension_semantics<parallel>, #tpu.dimension_semantics<arbitrary>], iteration_bounds = array<i64: 1, 1>, scalar_prefetch = 0 : i64, scratch_operands = 1 : i64, tpu.core_type = #tpu.core_type<tc>, window_params = [{transform_indices = @transform_0, window_bounds = array<i64: 16, 32>}, {pipeline_mode = #tpu.pipeline_mode<synchronous>, transform_indices = @transform_1, window_bounds = array<i64: 32, 128>}, {pipeline_mode = #tpu.pipeline_mode<synchronous>, transform_indices = @transform_2, window_bounds = array<i64: 1, 128>}, {pipeline_mode = #tpu.pipeline_mode<synchronous>, transform_indices = @transform_3, window_bounds = array<i64: 128, 128>}, {pipeline_mode = #tpu.pipeline_mode<synchronous>, transform_indices = @transform_4, window_bounds = array<i64: 1, 128>}, {pipeline_mode = #tpu.pipeline_mode<synchronous>, transform_indices = @transform_5, window_bounds = array<i64: 128, 128>}, {pipeline_mode = #tpu.pipeline_mode<synchronous>, transform_indices = @transform_6, window_bounds = array<i64: 1, 128>}, {transform_indices = @transform_7, window_bounds = array<i64: 16, 128>}]} {
    %c0_i32 = arith.constant 0 : i32
    %0 = arith.cmpi eq, %arg1, %c0_i32 : i32
    %1 = arith.extui %0 : i1 to i32
    %c0_i32_0 = arith.constant 0 : i32
    %2 = arith.cmpi ne, %1, %c0_i32_0 : i32
    scf.if %2 {
      %cst_10 = arith.constant 0.000000e+00 : f32
      %12 = vector.broadcast %cst_10 : f32 to vector<16x128xf32>
      %c0_11 = arith.constant 0 : index
      %c0_12 = arith.constant 0 : index
      %13 = vector.load %arg10[%c0_11, %c0_12] : memref<16x128xf32, #tpu.memory_space<vmem>>, vector<16x128xf32>
      tpu.vector_store %arg10[%c0_11, %c0_12], %12 {strides = array<i32>} : memref<16x128xf32, #tpu.memory_space<vmem>>, vector<16x128xf32>,
    } else {
    }
    %c0 = arith.constant 0 : index
    %c0_1 = arith.constant 0 : index
    %3 = vector.load %arg10[%c0, %c0_1] : memref<16x128xf32, #tpu.memory_space<vmem>>, vector<16x128xf32>
    %c0_2 = arith.constant 0 : index
    %c0_3 = arith.constant 0 : index
    %4 = vector.load %arg2[%c0_2, %c0_3] : memref<16x32xbf16, #tpu.memory_space<vmem>>, vector<16x32xbf16>
    %c0_4 = arith.constant 0 : index
    %c0_5 = arith.constant 0 : index
    %5 = vector.load %arg3[%c0_4, %c0_5] : memref<32x128xbf16, #tpu.memory_space<vmem>>, vector<32x128xbf16>
    %cst = arith.constant dense<0.000000e+00> : vector<16x128xf32>
    %6 = tpu.matmul %4, %5, %cst {dimension_numbers = #tpu.dot_dimension_numbers<[1], [0], [0], [1], [0, 0, 1, 1], [], []>} : vector<16x32xbf16>, vector<32x128xbf16>, vector<16x128xf32> -> vector<16x128xf32>
    %7 = arith.addf %3, %6 : vector<16x128xf32>
    %c0_6 = arith.constant 0 : index
    %c0_7 = arith.constant 0 : index
    %8 = vector.load %arg10[%c0_6, %c0_7] : memref<16x128xf32, #tpu.memory_space<vmem>>, vector<16x128xf32>
    tpu.vector_store %arg10[%c0_6, %c0_7], %7 {strides = array<i32>} : memref<16x128xf32, #tpu.memory_space<vmem>>, vector<16x128xf32>,
    %c0_i32_8 = arith.constant 0 : i32
    %9 = arith.cmpi eq, %arg1, %c0_i32_8 : i32
    %10 = arith.extui %9 : i1 to i32
    %c0_i32_9 = arith.constant 0 : i32
    %11 = arith.cmpi ne, %10, %c0_i32_9 : i32
    scf.if %11 {
      %c0_10 = arith.constant 0 : index
      %c0_11 = arith.constant 0 : index
      %12 = vector.load %arg10[%c0_10, %c0_11] : memref<16x128xf32, #tpu.memory_space<vmem>>, vector<16x128xf32>
      %c0_12 = arith.constant 0 : index
      %c0_13 = arith.constant 0 : index
      %13 = vector.load %arg4[%c0_12, %c0_13] : memref<1x128xf32, #tpu.memory_space<vmem>>, vector<1x128xf32>
      %14 = vector.broadcast %13 : vector<1x128xf32> to vector<16x128xf32>
      %15 = arith.addf %12, %14 : vector<16x128xf32>
      %cst_14 = arith.constant 0.000000e+00 : f32
      %16 = vector.broadcast %cst_14 : f32 to vector<16x128xf32>
      %17 = arith.maximumf %15, %16 : vector<16x128xf32>
      %18 = arith.truncf %17 : vector<16x128xf32> to vector<16x128xbf16>
      %c0_15 = arith.constant 0 : index
      %c0_16 = arith.constant 0 : index
      %19 = vector.load %arg5[%c0_15, %c0_16] : memref<128x128xbf16, #tpu.memory_space<vmem>>, vector<128x128xbf16>
      %cst_17 = arith.constant dense<0.000000e+00> : vector<16x128xf32>
      %20 = tpu.matmul %18, %19, %cst_17 {dimension_numbers = #tpu.dot_dimension_numbers<[1], [0], [0], [1], [0, 0, 1, 1], [], []>} : vector<16x128xbf16>, vector<128x128xbf16>, vector<16x128xf32> -> vector<16x128xf32>
      %c0_18 = arith.constant 0 : index
      %c0_19 = arith.constant 0 : index
      %21 = vector.load %arg6[%c0_18, %c0_19] : memref<1x128xf32, #tpu.memory_space<vmem>>, vector<1x128xf32>
      %22 = vector.broadcast %21 : vector<1x128xf32> to vector<16x128xf32>
      %23 = arith.addf %20, %22 : vector<16x128xf32>
      %cst_20 = arith.constant 0.000000e+00 : f32
      %24 = vector.broadcast %cst_20 : f32 to vector<16x128xf32>
      %25 = arith.maximumf %23, %24 : vector<16x128xf32>
      %26 = arith.truncf %25 : vector<16x128xf32> to vector<16x128xbf16>
      %c0_21 = arith.constant 0 : index
      %c0_22 = arith.constant 0 : index
      %27 = vector.load %arg7[%c0_21, %c0_22] : memref<128x128xbf16, #tpu.memory_space<vmem>>, vector<128x128xbf16>
      %cst_23 = arith.constant dense<0.000000e+00> : vector<16x128xf32>
      %28 = tpu.matmul %26, %27, %cst_23 {dimension_numbers = #tpu.dot_dimension_numbers<[1], [0], [0], [1], [0, 0, 1, 1], [], []>} : vector<16x128xbf16>, vector<128x128xbf16>, vector<16x128xf32> -> vector<16x128xf32>
      %c0_24 = arith.constant 0 : index
      %c0_25 = arith.constant 0 : index
      %29 = vector.load %arg8[%c0_24, %c0_25] : memref<1x128xf32, #tpu.memory_space<vmem>>, vector<1x128xf32>
      %30 = vector.broadcast %29 : vector<1x128xf32> to vector<16x128xf32>
      %31 = arith.addf %28, %30 : vector<16x128xf32>
      %32 = arith.truncf %31 : vector<16x128xf32> to vector<16x128xbf16>
      %c0_26 = arith.constant 0 : index
      %c0_27 = arith.constant 0 : index
      %33 = vector.load %arg9[%c0_26, %c0_27] : memref<16x128xbf16, #tpu.memory_space<vmem>>, vector<16x128xbf16>
      tpu.vector_store %arg9[%c0_26, %c0_27], %32 {strides = array<i32>} : memref<16x128xbf16, #tpu.memory_space<vmem>>, vector<16x128xbf16>,
    } else {
    }
    return
  }
  func.func @transform_0(%arg0: i32, %arg1: i32) -> (i32, i32) {
    %c0_i32 = arith.constant 0 : i32
    return %arg0, %arg1 : i32, i32
  }
  func.func @transform_1(%arg0: i32, %arg1: i32) -> (i32, i32) {
    %c0_i32 = arith.constant 0 : i32
    %c0_i32_0 = arith.constant 0 : i32
    %c0_i32_1 = arith.constant 0 : i32
    return %c0_i32, %c0_i32_0 : i32, i32
  }
  func.func @transform_2(%arg0: i32, %arg1: i32) -> (i32, i32) {
    %c0_i32 = arith.constant 0 : i32
    %c0_i32_0 = arith.constant 0 : i32
    %c0_i32_1 = arith.constant 0 : i32
    return %c0_i32, %c0_i32_0 : i32, i32
  }
  func.func @transform_3(%arg0: i32, %arg1: i32) -> (i32, i32) {
    %c0_i32 = arith.constant 0 : i32
    %c0_i32_0 = arith.constant 0 : i32
    %c0_i32_1 = arith.constant 0 : i32
    return %c0_i32, %c0_i32_0 : i32, i32
  }
  func.func @transform_4(%arg0: i32, %arg1: i32) -> (i32, i32) {
    %c0_i32 = arith.constant 0 : i32
    %c0_i32_0 = arith.constant 0 : i32
    %c0_i32_1 = arith.constant 0 : i32
    return %c0_i32, %c0_i32_0 : i32, i32
  }
  func.func @transform_5(%arg0: i32, %arg1: i32) -> (i32, i32) {
    %c0_i32 = arith.constant 0 : i32
    %c0_i32_0 = arith.constant 0 : i32
    %c0_i32_1 = arith.constant 0 : i32
    return %c0_i32, %c0_i32_0 : i32, i32
  }
  func.func @transform_6(%arg0: i32, %arg1: i32) -> (i32, i32) {
    %c0_i32 = arith.constant 0 : i32
    %c0_i32_0 = arith.constant 0 : i32
    %c0_i32_1 = arith.constant 0 : i32
    return %c0_i32, %c0_i32_0 : i32, i32
  }
  func.func @transform_7(%arg0: i32, %arg1: i32) -> (i32, i32) {
    %c0_i32 = arith.constant 0 : i32
    %c0_i32_0 = arith.constant 0 : i32
    return %arg0, %c0_i32 : i32, i32
  }
}

</mosaic_0001>

<bundles_post_ra>
// kernel: tpu_custom_call.1
= control target key start
LH: loop header
LB: loop body
LE: loop exit
PB: predicated region body
PF: predicated region fallthrough
CT: control target
= control target key end

     0   :  { %12 = vsyncpa [#allocation4], 0  ;;  %s854_s0 = inlined_call_operand.hbm [shape: bf16[16,32], index: 0, kind: input, shape index: {}]   ;;  %s855_s1 = inlined_call_operand.hbm [shape: bf16[32,128], index: 1, kind: input, shape index: {}]   ;;  %s856_s2 = inlined_call_operand.vmem [shape: f32[1,128], index: 2, kind: input, shape index: {}]   ;;  %s857_s3 = inlined_call_operand.hbm [shape: bf16[128,128], index: 3, kind: input, shape index: {}]   ;;  %s858_s4 = inlined_call_operand.vmem [shape: f32[1,128], index: 4, kind: input, shape index: {}]   ;;  %s859_s5 = inlined_call_operand.hbm [shape: bf16[128,128], index: 5, kind: input, shape index: {}]   ;;  %s860_s6 = inlined_call_operand.vmem [shape: f32[1,128], index: 6, kind: input, shape index: {}]   ;;  %s861_s7 = inlined_call_operand.hbm [shape: bf16[16,128], index: 7, kind: output, shape index: {}]  }
   0x1   :  { %13 = vsyncpa [#allocation7], 0 }
   0x2   :  { %14 = vsyncpa [#allocation10], 0 }
   0x3   :  { %15 = vsyncpa [#allocation5], 0  ;;  %s683_s24 = smov [#allocation6]   ;;  %s684_s26 = smov [#allocation3]  }
   0x4   :  { %s33_s25 = sshll.u32 %s683_s24, 4  ;;  %s21_s27 = sshll.u32 %s684_s26, 4  ;;  %s34_s25 = int_to_ptr.vmem [resolvable:$true] %s33_s25  ;;  %s732_s27 = int_to_ptr.vmem [resolvable:$true] %s21_s27 }
   0x5   :  { %s565_s30 = scalar_lea.hbm %s855_s1, 256 }
   0x6   :  { %p566_p0 = scmp.ne.s32.totalorder %s855_s1, %s565_s30  ;;  %p569_p1 = scmp.lt.u32.totalorder %s565_s30, %s855_s1 }
   0x8   :  { %p571_p2 = pnand %p569_p1, %p566_p0 }
   0xa   :  { %574 = shalt.err (!%p571_p2)
}
   0xb   :  { %s575_s12 = scalar_lea.vmem %s34_s25, 256  ;;  %p580_p4 = scmp.lt.s32.totalorder %s34_s25, %s34_s25 }
   0xc   :  { %p576_p3 = scmp.ne.s32.totalorder %s34_s25, %s575_s12  ;;  %p581_p5 = scmp.lt.s32.totalorder %s575_s12, %s575_s12 }
   0xe   :  { %p582_p6 = por %p581_p5, %p580_p4 }
  0x10   :  { %p583_p7 = pnand %p582_p6, %p576_p3 }
  0x12   :  { %586 = shalt.err (!%p583_p7)
}
  0x13   :  { %s685_s13 = smov 64   ;;  %s686_s14 = smov 4  }
  0x14   :  { %39 = dma.hbm_to_vmem [thread:$0]  %s855_s1, 256, %s34_s25, [#allocation7], %s685_s13, %s685_s13, %s686_s14  }
  0x15   :  { %s587_s19 = scalar_lea.hbm %s854_s0, 128 }
  0x16   :  { %p588_p8 = scmp.ne.s32.totalorder %s854_s0, %s587_s19  ;;  %p591_p9 = scmp.lt.u32.totalorder %s587_s19, %s854_s0 }
  0x18   :  { %p593_p10 = pnand %p591_p9, %p588_p8 }
  0x1a   :  { %596 = shalt.err (!%p593_p10)
}
  0x1b   :  { %s597_s24 = scalar_lea.vmem %s732_s27, 128  ;;  %p602_p12 = scmp.lt.s32.totalorder %s732_s27, %s732_s27 }
  0x1c   :  { %p598_p11 = scmp.ne.s32.totalorder %s732_s27, %s597_s24  ;;  %p603_p13 = scmp.lt.s32.totalorder %s597_s24, %s597_s24 }
  0x1e   :  { %p604_p0 = por %p603_p13, %p602_p12 }
  0x20   :  { %p605_p1 = pnand %p604_p0, %p598_p11 }
  0x22   :  { %608 = shalt.err (!%p605_p1)
}
  0x23   :  { %27 = dma.hbm_to_vmem [thread:$0]  %s854_s0, 128, %s732_s27, [#allocation4], %s685_s13, %s685_s13, %s686_s14  }
  0x24   :  { %s687_s26 = smov [#allocation8]   ;;  %s688_s29 = smov [#allocation9]  }
  0x25   :  { %s47_s28 = sshll.u32 %s687_s26, 4  ;;  %s61_s30 = sshll.u32 %s688_s29, 4  ;;  %s48_s28 = int_to_ptr.vmem [resolvable:$true] %s47_s28  ;;  %s769_s30 = int_to_ptr.vmem [resolvable:$true] %s61_s30 }
  0x26   :  { %s609_s10 = scalar_lea.hbm %s857_s3, 1024 }
  0x27   :  { %p610_p2 = scmp.ne.s32.totalorder %s857_s3, %s609_s10  ;;  %p613_p3 = scmp.lt.u32.totalorder %s609_s10, %s857_s3 }
  0x29   :  { %p615_p4 = pnand %p613_p3, %p610_p2 }
  0x2b   :  { %618 = shalt.err (!%p615_p4)
}
  0x2c   :  { %s619_s0 = scalar_lea.vmem %s48_s28, 1024  ;;  %p624_p6 = scmp.lt.s32.totalorder %s48_s28, %s48_s28 }
  0x2d   :  { %p620_p5 = scmp.ne.s32.totalorder %s48_s28, %s619_s0  ;;  %p625_p7 = scmp.lt.s32.totalorder %s619_s0, %s619_s0 }
  0x2f   :  { %p626_p8 = por %p625_p7, %p624_p6 }
  0x31   :  { %p627_p9 = pnand %p626_p8, %p620_p5 }
  0x33   :  { %630 = shalt.err (!%p627_p9)
}
  0x34   :  { %53 = dma.hbm_to_vmem [thread:$0]  %s857_s3, 1024, %s48_s28, [#allocation7], %s685_s13, %s685_s13, %s686_s14  }
  0x35   :  { %s631_s20 = scalar_lea.hbm %s859_s5, 1024 }
  0x36   :  { %p632_p10 = scmp.ne.s32.totalorder %s859_s5, %s631_s20  ;;  %p635_p11 = scmp.lt.u32.totalorder %s631_s20, %s859_s5 }
  0x38   :  { %p637_p12 = pnand %p635_p11, %p632_p10 }
  0x3a   :  { %640 = shalt.err (!%p637_p12)
}
  0x3b   :  { %s641_s1 = scalar_lea.vmem %s769_s30, 1024  ;;  %p646_p0 = scmp.lt.s32.totalorder %s769_s30, %s769_s30 }
  0x3c   :  { %p642_p13 = scmp.ne.s32.totalorder %s769_s30, %s641_s1  ;;  %p647_p1 = scmp.lt.s32.totalorder %s641_s1, %s641_s1 }
  0x3e   :  { %p648_p2 = por %p647_p1, %p646_p0 }
  0x40   :  { %p649_p3 = pnand %p648_p2, %p642_p13 }
  0x42   :  { %652 = shalt.err (!%p649_p3)
}
  0x43   :  { %67 = dma.hbm_to_vmem [thread:$0]  %s859_s5, 1024, %s769_s30, [#allocation10], %s685_s13, %s685_s13, %s686_s14  }
  0x44   :  { %675 = dma.done.wait [#allocation4], 128  }
  0x45   :  { %676 = vsyncadd [#allocation4], 4294967168 }
  0x46   :  { %677 = dma.done.wait [#allocation7], 1280  }
  0x47   :  { %678 = vsyncadd [#allocation7], 4294966016 }
  0x48   :  { %679 = dma.done.wait [#allocation10], 1024  }
  0x49   :  { %680 = vsyncadd [#allocation10], 4294966272  ;;  %v689_v0 = vmov 0.0   ;;  %vm690_vm0 = vmmov 0   ;;  %v546_v1 = vld [vmem:[#allocation6] sm:$0xff]   ;;  %v547_v2 = vld [vmem:[#allocation6 + $0x8] sm:$0xff]  }
  0x4a   :  { %489 = vmatprep.subr.bf16.mxu0 %v689_v0  ;;  %493 = vmatprep.mubr.msk.bf16.mxu0 %vm690_vm0, %v689_v0  ;;  %v549_v3 = vld [vmem:[#allocation8] sm:$0xff]   ;;  %v548_v4 = vld [vmem:[#allocation3] sm:$0xff]   ;;  %vm114_vm1 = vcmask 261120   ;;  %v551_v6 = vld [vmem:[#allocation8 + $0x10] sm:$0xff]   ;;  %s691_s8 = smov [#allocation11]  }
  0x4b   :  { %497 = vmatprep.subr.bf16.mxu1 %v689_v0  ;;  %513 = vmatprep.mubr.msk.bf16.mxu1 %vm690_vm0, %v689_v0  ;;  %v550_v5 = vld [vmem:[#allocation8 + $0x8] sm:$0xff]   ;;  %v552_v7 = vld [vmem:[#allocation8 + $0x18] sm:$0xff]   ;;  %v553_v8 = vld [vmem:[#allocation8 + $0x20] sm:$0xff]   ;;  %s422_s9 = sshll.u32 %s691_s8, 4  ;;  %s423_s9 = int_to_ptr.vmem [resolvable:$true] %s422_s9 }
  0x4c   :  { %490 = vmatpush3.bf16.msra.mxu0 %v546_v1  ;;  %498 = vmatpush3.bf16.msra.mxu1 %v549_v3  ;;  %v554_v9 = vld [vmem:[#allocation8 + $0x28] sm:$0xff]   ;;  %v555_v10 = vld [vmem:[#allocation8 + $0x30] sm:$0xff]   ;;  %v556_v11 = vld [vmem:[#allocation8 + $0x38] sm:$0xff]   ;;  %p658_p5 = scmp.lt.s32.totalorder %s423_s9, %s423_s9 }
  0x4d   :  { %491 = vmatprep.subr.bf16.mxu0 %v689_v0  ;;  %499 = vmatprep.subr.bf16.mxu1 %v689_v0  ;;  %v557_v12 = vld [vmem:[#allocation9] sm:$0xff]   ;;  %v558_v13 = vld [vmem:[#allocation9 + $0x8] sm:$0xff]   ;;  %v559_v14 = vld [vmem:[#allocation9 + $0x10] sm:$0xff]  }
  0x4e   :  { %v560_v15 = vld [vmem:[#allocation9 + $0x18] sm:$0xff]   ;;  %v561_v16 = vld [vmem:[#allocation9 + $0x20] sm:$0xff]   ;;  %v562_v17 = vld [vmem:[#allocation9 + $0x28] sm:$0xff]  }
  0x4f   :  { %v440_v18 = vld [vmem:[%s856_s2] ss:$0 sm:$0xff]  ;;  %v563_v28 = vld [vmem:[#allocation9 + $0x30] sm:$0xff]   ;;  %v564_v29 = vld [vmem:[#allocation9 + $0x38] sm:$0xff]  }
  0x50   :  { %492 = vmatpush3.bf16.msra.mxu0 %v547_v2  ;;  %500 = vmatpush3.bf16.msra.mxu1 %v550_v5  ;;  %v441_v30 = vld [vmem:[%s858_s4] ss:$0 sm:$0xff]  ;;  %s653_s4 = scalar_lea.vmem %s423_s9, 128 }
  0x51   :  { %517 = vmatprep.subr.bf16.mxu0 %v689_v0  ;;  %501 = vmatprep.subr.bf16.mxu1 %v689_v0  ;;  %v450_v40 = vld [vmem:[%s860_s6] ss:$0 sm:$0xff]  ;;  %p654_p4 = scmp.ne.s32.totalorder %s423_s9, %s653_s4  ;;  %p659_p6 = scmp.lt.s32.totalorder %s653_s4, %s653_s4 }
  0x53   :  { %494 = vmatmul.mubr.msk.bf16.vlgmr.msra.gmra.mrb[0].mxu0 %vm114_vm1, %v548_v4  ;;  %p660_p7 = por %p659_p6, %p658_p5 }
  0x54   :  { %533 = vmatprep.mubr.msk.bf16.mxu0 %vm690_vm0, %v689_v0  ;;  %502 = vmatpush3.bf16.msra.mxu1 %v551_v6 }
  0x55   :  { %503 = vmatprep.subr.bf16.mxu1 %v689_v0  ;;  %518 = vmatpush3.bf16.msra.mxu0 %v557_v12  ;;  %p661_p8 = pnand %p660_p7, %p654_p4 }
  0x56   :  { %519 = vmatprep.subr.bf16.mxu0 %v689_v0 }
  0x58   :  { %504 = vmatpush3.bf16.msra.mxu1 %v552_v7 }
  0x59   :  { %505 = vmatprep.subr.bf16.mxu1 %v689_v0  ;;  %520 = vmatpush3.bf16.msra.mxu0 %v558_v13 }
  0x5a   :  { %521 = vmatprep.subr.bf16.mxu0 %v689_v0 }
  0x5c   :  { %506 = vmatpush3.bf16.msra.mxu1 %v553_v8 }
  0x5d   :  { %507 = vmatprep.subr.bf16.mxu1 %v689_v0  ;;  %522 = vmatpush3.bf16.msra.mxu0 %v559_v14 }
  0x5e   :  { %523 = vmatprep.subr.bf16.mxu0 %v689_v0 }
  0x60   :  { %508 = vmatpush3.bf16.msra.mxu1 %v554_v9 }
  0x61   :  { %509 = vmatprep.subr.bf16.mxu1 %v689_v0  ;;  %524 = vmatpush3.bf16.msra.mxu0 %v560_v15 }
  0x62   :  { %525 = vmatprep.subr.bf16.mxu0 %v689_v0 }
  0x64   :  { %510 = vmatpush3.bf16.msra.mxu1 %v555_v10 }
  0x65   :  { %511 = vmatprep.subr.bf16.mxu1 %v689_v0  ;;  %526 = vmatpush3.bf16.msra.mxu0 %v561_v16 }
  0x66   :  { %527 = vmatprep.subr.bf16.mxu0 %v689_v0 }
  0x68   :  { %512 = vmatpush3.bf16.msra.mxu1 %v556_v11 }
  0x69   :  { %528 = vmatpush3.bf16.msra.mxu0 %v562_v17 }
  0x6a   :  { %529 = vmatprep.subr.bf16.mxu0 %v689_v0 }
  0x6d   :  { %530 = vmatpush3.bf16.msra.mxu0 %v563_v28 }
  0x6e   :  { %531 = vmatprep.subr.bf16.mxu0 %v689_v0 }
  0x71   :  { %532 = vmatpush3.bf16.msra.mxu0 %v564_v29 }
 0x126   :  { %v152_v19 = vpop.f32.mrb[0].mxu0 }
 0x127   :  { %v175_v20 = vadd.f32 %v440_v18, %v152_v19  ;;  %v495_v21 = vpop.f32.mrb[1].mxu0 }
 0x128   :  { %v155_v22 = vpop.f32.mrb[2].mxu0 }
 0x129   :  { %v176_v23 = vadd.f32 %v440_v18, %v155_v22  ;;  %v496_v24 = vpop.f32.mrb[3].mxu0  ;;  %v177_v25 = vmax.f32 %v175_v20, 0.0 }
 0x12b   :  { %v178_v26 = vmax.f32 %v176_v23, 0.0 }
 0x12d   :  { %v179_v27 = vpack.c.bf16 %v178_v26, %v177_v25 }
 0x12f   :  { %514 = vmatmul.mubr.bf16.vlgmr.msra.gmra.mrb[0].mxu1 %v179_v27 }
 0x202   :  { %v285_v31 = vpop.f32.mrb[0].mxu1 }
 0x203   :  { %v286_v32 = vadd.f32 %v441_v30, %v285_v31  ;;  %v515_v33 = vpop.f32.mrb[1].mxu1 }
 0x204   :  { %v288_v34 = vpop.f32.mrb[2].mxu1 }
 0x205   :  { %v289_v35 = vadd.f32 %v441_v30, %v288_v34  ;;  %v516_v36 = vpop.f32.mrb[3].mxu1  ;;  %v292_v37 = vmax.f32 %v286_v32, 0.0 }
 0x207   :  { %v293_v38 = vmax.f32 %v289_v35, 0.0 }
 0x209   :  { %v294_v39 = vpack.c.bf16 %v293_v38, %v292_v37 }
 0x20b   :  { %534 = vmatmul.mubr.bf16.vlgmr.msra.gmra.mrb[4].mxu0 %v294_v39 }
 0x2de   :  { %v400_v41 = vpop.f32.mrb[4].mxu0 }
 0x2df   :  { %v535_v42 = vpop.f32.mrb[5].mxu0  ;;  %v401_v44 = vadd.f32 %v450_v40, %v400_v41 }
 0x2e0   :  { %v403_v43 = vpop.f32.mrb[6].mxu0 }
 0x2e1   :  { %v404_v45 = vadd.f32 %v450_v40, %v403_v43  ;;  %v536_v46 = vpop.f32.mrb[7].mxu0 }
 0x2e3   :  { %v466_v47 = vpack.c.bf16 %v404_v45, %v401_v44 }
 0x2e5   :  { %467 = vst [vmem:[#allocation11] sm:$0xff] %v466_v47  }
 0x2e6   :  { %664 = shalt.err (!%p661_p8)
}
 0x2e7   :  { %s665_s11 = scalar_lea.hbm %s861_s7, 128 }
 0x2e8   :  { %p666_p9 = scmp.ne.s32.totalorder %s861_s7, %s665_s11  ;;  %p669_p10 = scmp.lt.u32.totalorder %s665_s11, %s861_s7 }
 0x2ea   :  { %p671_p11 = pnand %p669_p10, %p666_p9 }
 0x2ec   :  { %674 = shalt.err (!%p671_p11)
}
 0x2ed   :  { %428 = dma.vmem_to_hbm [thread:$0]  %s423_s9, 128, %s861_s7, [#allocation5], %s685_s13, %s685_s13, %s686_s14  }
 0x2ee   :  { %681 = dma.done.wait [#allocation5], 128  }
 0x2ef   :  { %682 = vsyncadd [#allocation5], 4294967168 }
 0x2f0   :  { %432 = vsyncpa [#allocation4], 1 }
 0x2f1   :  { %433 = vsyncpa [#allocation7], 1 }
 0x2f2   :  { %434 = vsyncpa [#allocation10], 1 }
 0x2f3   :  { %435 = vsyncpa [#allocation5], 1 }

// kernel: tpu_custom_call.1
= control target key start
LH: loop header
LB: loop body
LE: loop exit
PB: predicated region body
PF: predicated region fallthrough
CT: control target
= control target key end

     0   :  { %12 = vsyncpa [#allocation4], 0  ;;  %s854_s0 = inlined_call_operand.hbm [shape: bf16[16,32], index: 0, kind: input, shape index: {}]   ;;  %s855_s1 = inlined_call_operand.hbm [shape: bf16[32,128], index: 1, kind: input, shape index: {}]   ;;  %s856_s2 = inlined_call_operand.vmem [shape: f32[1,128], index: 2, kind: input, shape index: {}]   ;;  %s857_s3 = inlined_call_operand.hbm [shape: bf16[128,128], index: 3, kind: input, shape index: {}]   ;;  %s858_s4 = inlined_call_operand.vmem [shape: f32[1,128], index: 4, kind: input, shape index: {}]   ;;  %s859_s5 = inlined_call_operand.hbm [shape: bf16[128,128], index: 5, kind: input, shape index: {}]   ;;  %s860_s6 = inlined_call_operand.vmem [shape: f32[1,128], index: 6, kind: input, shape index: {}]   ;;  %s861_s7 = inlined_call_operand.hbm [shape: bf16[16,128], index: 7, kind: output, shape index: {}]  }
   0x1   :  { %13 = vsyncpa [#allocation7], 0 }
   0x2   :  { %14 = vsyncpa [#allocation10], 0 }
   0x3   :  { %15 = vsyncpa [#allocation5], 0  ;;  %s683_s24 = smov [#allocation6]   ;;  %s684_s26 = smov [#allocation3]  }
   0x4   :  { %s33_s25 = sshll.u32 %s683_s24, 4  ;;  %s21_s27 = sshll.u32 %s684_s26, 4  ;;  %s34_s25 = int_to_ptr.vmem [resolvable:$true] %s33_s25  ;;  %s732_s27 = int_to_ptr.vmem [resolvable:$true] %s21_s27 }
   0x5   :  { %s565_s30 = scalar_lea.hbm %s855_s1, 256 }
   0x6   :  { %p566_p0 = scmp.ne.s32.totalorder %s855_s1, %s565_s30  ;;  %p569_p1 = scmp.lt.u32.totalorder %s565_s30, %s855_s1 }
   0x8   :  { %p571_p2 = pnand %p569_p1, %p566_p0 }
   0xa   :  { %574 = shalt.err (!%p571_p2)
}
   0xb   :  { %s575_s12 = scalar_lea.vmem %s34_s25, 256  ;;  %p580_p4 = scmp.lt.s32.totalorder %s34_s25, %s34_s25 }
   0xc   :  { %p576_p3 = scmp.ne.s32.totalorder %s34_s25, %s575_s12  ;;  %p581_p5 = scmp.lt.s32.totalorder %s575_s12, %s575_s12 }
   0xe   :  { %p582_p6 = por %p581_p5, %p580_p4 }
  0x10   :  { %p583_p7 = pnand %p582_p6, %p576_p3 }
  0x12   :  { %586 = shalt.err (!%p583_p7)
}
  0x13   :  { %s685_s13 = smov 64   ;;  %s686_s14 = smov 4  }
  0x14   :  { %39 = dma.hbm_to_vmem [thread:$0]  %s855_s1, 256, %s34_s25, [#allocation7], %s685_s13, %s685_s13, %s686_s14  }
  0x15   :  { %s587_s19 = scalar_lea.hbm %s854_s0, 128 }
  0x16   :  { %p588_p8 = scmp.ne.s32.totalorder %s854_s0, %s587_s19  ;;  %p591_p9 = scmp.lt.u32.totalorder %s587_s19, %s854_s0 }
  0x18   :  { %p593_p10 = pnand %p591_p9, %p588_p8 }
  0x1a   :  { %596 = shalt.err (!%p593_p10)
}
  0x1b   :  { %s597_s24 = scalar_lea.vmem %s732_s27, 128  ;;  %p602_p12 = scmp.lt.s32.totalorder %s732_s27, %s732_s27 }
  0x1c   :  { %p598_p11 = scmp.ne.s32.totalorder %s732_s27, %s597_s24  ;;  %p603_p13 = scmp.lt.s32.totalorder %s597_s24, %s597_s24 }
  0x1e   :  { %p604_p0 = por %p603_p13, %p602_p12 }
  0x20   :  { %p605_p1 = pnand %p604_p0, %p598_p11 }
  0x22   :  { %608 = shalt.err (!%p605_p1)
}
  0x23   :  { %27 = dma.hbm_to_vmem [thread:$0]  %s854_s0, 128, %s732_s27, [#allocation4], %s685_s13, %s685_s13, %s686_s14  }
  0x24   :  { %s687_s26 = smov [#allocation8]   ;;  %s688_s29 = smov [#allocation9]  }
  0x25   :  { %s47_s28 = sshll.u32 %s687_s26, 4  ;;  %s61_s30 = sshll.u32 %s688_s29, 4  ;;  %s48_s28 = int_to_ptr.vmem [resolvable:$true] %s47_s28  ;;  %s769_s30 = int_to_ptr.vmem [resolvable:$true] %s61_s30 }
  0x26   :  { %s609_s10 = scalar_lea.hbm %s857_s3, 1024 }
  0x27   :  { %p610_p2 = scmp.ne.s32.totalorder %s857_s3, %s609_s10  ;;  %p613_p3 = scmp.lt.u32.totalorder %s609_s10, %s857_s3 }
  0x29   :  { %p615_p4 = pnand %p613_p3, %p610_p2 }
  0x2b   :  { %618 = shalt.err (!%p615_p4)
}
  0x2c   :  { %s619_s0 = scalar_lea.vmem %s48_s28, 1024  ;;  %p624_p6 = scmp.lt.s32.totalorder %s48_s28, %s48_s28 }
  0x2d   :  { %p620_p5 = scmp.ne.s32.totalorder %s48_s28, %s619_s0  ;;  %p625_p7 = scmp.lt.s32.totalorder %s619_s0, %s619_s0 }
  0x2f   :  { %p626_p8 = por %p625_p7, %p624_p6 }
  0x31   :  { %p627_p9 = pnand %p626_p8, %p620_p5 }
  0x33   :  { %630 = shalt.err (!%p627_p9)
}
  0x34   :  { %53 = dma.hbm_to_vmem [thread:$0]  %s857_s3, 1024, %s48_s28, [#allocation7], %s685_s13, %s685_s13, %s686_s14  }
  0x35   :  { %s631_s20 = scalar_lea.hbm %s859_s5, 1024 }
  0x36   :  { %p632_p10 = scmp.ne.s32.totalorder %s859_s5, %s631_s20  ;;  %p635_p11 = scmp.lt.u32.totalorder %s631_s20, %s859_s5 }
  0x38   :  { %p637_p12 = pnand %p635_p11, %p632_p10 }
  0x3a   :  { %640 = shalt.err (!%p637_p12)
}
  0x3b   :  { %s641_s1 = scalar_lea.vmem %s769_s30, 1024  ;;  %p646_p0 = scmp.lt.s32.totalorder %s769_s30, %s769_s30 }
  0x3c   :  { %p642_p13 = scmp.ne.s32.totalorder %s769_s30, %s641_s1  ;;  %p647_p1 = scmp.lt.s32.totalorder %s641_s1, %s641_s1 }
  0x3e   :  { %p648_p2 = por %p647_p1, %p646_p0 }
  0x40   :  { %p649_p3 = pnand %p648_p2, %p642_p13 }
  0x42   :  { %652 = shalt.err (!%p649_p3)
}
  0x43   :  { %67 = dma.hbm_to_vmem [thread:$0]  %s859_s5, 1024, %s769_s30, [#allocation10], %s685_s13, %s685_s13, %s686_s14  }
  0x44   :  { %675 = dma.done.wait [#allocation4], 128  }
  0x45   :  { %676 = vsyncadd [#allocation4], 4294967168 }
  0x46   :  { %677 = dma.done.wait [#allocation7], 1280  }
  0x47   :  { %678 = vsyncadd [#allocation7], 4294966016 }
  0x48   :  { %679 = dma.done.wait [#allocation10], 1024  }
  0x49   :  { %680 = vsyncadd [#allocation10], 4294966272  ;;  %v689_v0 = vmov 0.0   ;;  %vm690_vm0 = vmmov 0   ;;  %v546_v1 = vld [vmem:[#allocation6] sm:$0xff]   ;;  %v547_v2 = vld [vmem:[#allocation6 + $0x8] sm:$0xff]  }
  0x4a   :  { %489 = vmatprep.subr.bf16.mxu0 %v689_v0  ;;  %493 = vmatprep.mubr.msk.bf16.mxu0 %vm690_vm0, %v689_v0  ;;  %v549_v3 = vld [vmem:[#allocation8] sm:$0xff]   ;;  %v548_v4 = vld [vmem:[#allocation3] sm:$0xff]   ;;  %vm114_vm1 = vcmask 261120   ;;  %v551_v6 = vld [vmem:[#allocation8 + $0x10] sm:$0xff]   ;;  %s691_s8 = smov [#allocation11]  }
  0x4b   :  { %497 = vmatprep.subr.bf16.mxu1 %v689_v0  ;;  %513 = vmatprep.mubr.msk.bf16.mxu1 %vm690_vm0, %v689_v0  ;;  %v550_v5 = vld [vmem:[#allocation8 + $0x8] sm:$0xff]   ;;  %v552_v7 = vld [vmem:[#allocation8 + $0x18] sm:$0xff]   ;;  %v553_v8 = vld [vmem:[#allocation8 + $0x20] sm:$0xff]   ;;  %s422_s9 = sshll.u32 %s691_s8, 4  ;;  %s423_s9 = int_to_ptr.vmem [resolvable:$true] %s422_s9 }
  0x4c   :  { %490 = vmatpush3.bf16.msra.mxu0 %v546_v1  ;;  %498 = vmatpush3.bf16.msra.mxu1 %v549_v3  ;;  %v554_v9 = vld [vmem:[#allocation8 + $0x28] sm:$0xff]   ;;  %v555_v10 = vld [vmem:[#allocation8 + $0x30] sm:$0xff]   ;;  %v556_v11 = vld [vmem:[#allocation8 + $0x38] sm:$0xff]   ;;  %p658_p5 = scmp.lt.s32.totalorder %s423_s9, %s423_s9 }
  0x4d   :  { %491 = vmatprep.subr.bf16.mxu0 %v689_v0  ;;  %499 = vmatprep.subr.bf16.mxu1 %v689_v0  ;;  %v557_v12 = vld [vmem:[#allocation9] sm:$0xff]   ;;  %v558_v13 = vld [vmem:[#allocation9 + $0x8] sm:$0xff]   ;;  %v559_v14 = vld [vmem:[#allocation9 + $0x10] sm:$0xff]  }
  0x4e   :  { %v560_v15 = vld [vmem:[#allocation9 + $0x18] sm:$0xff]   ;;  %v561_v16 = vld [vmem:[#allocation9 + $0x20] sm:$0xff]   ;;  %v562_v17 = vld [vmem:[#allocation9 + $0x28] sm:$0xff]  }
  0x4f   :  { %v440_v18 = vld [vmem:[%s856_s2] ss:$0 sm:$0xff]  ;;  %v563_v28 = vld [vmem:[#allocation9 + $0x30] sm:$0xff]   ;;  %v564_v29 = vld [vmem:[#allocation9 + $0x38] sm:$0xff]  }
  0x50   :  { %492 = vmatpush3.bf16.msra.mxu0 %v547_v2  ;;  %500 = vmatpush3.bf16.msra.mxu1 %v550_v5  ;;  %v441_v30 = vld [vmem:[%s858_s4] ss:$0 sm:$0xff]  ;;  %s653_s4 = scalar_lea.vmem %s423_s9, 128 }
  0x51   :  { %517 = vmatprep.subr.bf16.mxu0 %v689_v0  ;;  %501 = vmatprep.subr.bf16.mxu1 %v689_v0  ;;  %v450_v40 = vld [vmem:[%s860_s6] ss:$0 sm:$0xff]  ;;  %p654_p4 = scmp.ne.s32.totalorder %s423_s9, %s653_s4  ;;  %p659_p6 = scmp.lt.s32.totalorder %s653_s4, %s653_s4 }
  0x53   :  { %494 = vmatmul.mubr.msk.bf16.vlgmr.msra.gmra.mrb[0].mxu0 %vm114_vm1, %v548_v4  ;;  %p660_p7 = por %p659_p6, %p658_p5 }
  0x54   :  { %533 = vmatprep.mubr.msk.bf16.mxu0 %vm690_vm0, %v689_v0  ;;  %502 = vmatpush3.bf16.msra.mxu1 %v551_v6 }
  0x55   :  { %503 = vmatprep.subr.bf16.mxu1 %v689_v0  ;;  %518 = vmatpush3.bf16.msra.mxu0 %v557_v12  ;;  %p661_p8 = pnand %p660_p7, %p654_p4 }
  0x56   :  { %519 = vmatprep.subr.bf16.mxu0 %v689_v0 }
  0x58   :  { %504 = vmatpush3.bf16.msra.mxu1 %v552_v7 }
  0x59   :  { %505 = vmatprep.subr.bf16.mxu1 %v689_v0  ;;  %520 = vmatpush3.bf16.msra.mxu0 %v558_v13 }
  0x5a   :  { %521 = vmatprep.subr.bf16.mxu0 %v689_v0 }
  0x5c   :  { %506 = vmatpush3.bf16.msra.mxu1 %v553_v8 }
  0x5d   :  { %507 = vmatprep.subr.bf16.mxu1 %v689_v0  ;;  %522 = vmatpush3.bf16.msra.mxu0 %v559_v14 }
  0x5e   :  { %523 = vmatprep.subr.bf16.mxu0 %v689_v0 }
  0x60   :  { %508 = vmatpush3.bf16.msra.mxu1 %v554_v9 }
  0x61   :  { %509 = vmatprep.subr.bf16.mxu1 %v689_v0  ;;  %524 = vmatpush3.bf16.msra.mxu0 %v560_v15 }
  0x62   :  { %525 = vmatprep.subr.bf16.mxu0 %v689_v0 }
  0x64   :  { %510 = vmatpush3.bf16.msra.mxu1 %v555_v10 }
  0x65   :  { %511 = vmatprep.subr.bf16.mxu1 %v689_v0  ;;  %526 = vmatpush3.bf16.msra.mxu0 %v561_v16 }
  0x66   :  { %527 = vmatprep.subr.bf16.mxu0 %v689_v0 }
  0x68   :  { %512 = vmatpush3.bf16.msra.mxu1 %v556_v11 }
  0x69   :  { %528 = vmatpush3.bf16.msra.mxu0 %v562_v17 }
  0x6a   :  { %529 = vmatprep.subr.bf16.mxu0 %v689_v0 }
  0x6d   :  { %530 = vmatpush3.bf16.msra.mxu0 %v563_v28 }
  0x6e   :  { %531 = vmatprep.subr.bf16.mxu0 %v689_v0 }
  0x71   :  { %532 = vmatpush3.bf16.msra.mxu0 %v564_v29 }
 0x126   :  { %v152_v19 = vpop.f32.mrb[0].mxu0 }
 0x127   :  { %v175_v20 = vadd.f32 %v440_v18, %v152_v19  ;;  %v495_v21 = vpop.f32.mrb[1].mxu0 }
 0x128   :  { %v155_v22 = vpop.f32.mrb[2].mxu0 }
 0x129   :  { %v176_v23 = vadd.f32 %v440_v18, %v155_v22  ;;  %v496_v24 = vpop.f32.mrb[3].mxu0  ;;  %v177_v25 = vmax.f32 %v175_v20, 0.0 }
 0x12b   :  { %v178_v26 = vmax.f32 %v176_v23, 0.0 }
 0x12d   :  { %v179_v27 = vpack.c.bf16 %v178_v26, %v177_v25 }
 0x12f   :  { %514 = vmatmul.mubr.bf16.vlgmr.msra.gmra.mrb[0].mxu1 %v179_v27 }
 0x202   :  { %v285_v31 = vpop.f32.mrb[0].mxu1 }
 0x203   :  { %v286_v32 = vadd.f32 %v441_v30, %v285_v31  ;;  %v515_v33 = vpop.f32.mrb[1].mxu1 }
 0x204   :  { %v288_v34 = vpop.f32.mrb[2].mxu1 }
 0x205   :  { %v289_v35 = vadd.f32 %v441_v30, %v288_v34  ;;  %v516_v36 = vpop.f32.mrb[3].mxu1  ;;  %v292_v37 = vmax.f32 %v286_v32, 0.0 }
 0x207   :  { %v293_v38 = vmax.f32 %v289_v35, 0.0 }
 0x209   :  { %v294_v39 = vpack.c.bf16 %v293_v38, %v292_v37 }
 0x20b   :  { %534 = vmatmul.mubr.bf16.vlgmr.msra.gmra.mrb[4].mxu0 %v294_v39 }
 0x2de   :  { %v400_v41 = vpop.f32.mrb[4].mxu0 }
 0x2df   :  { %v535_v42 = vpop.f32.mrb[5].mxu0  ;;  %v401_v44 = vadd.f32 %v450_v40, %v400_v41 }
 0x2e0   :  { %v403_v43 = vpop.f32.mrb[6].mxu0 }
 0x2e1   :  { %v404_v45 = vadd.f32 %v450_v40, %v403_v43  ;;  %v536_v46 = vpop.f32.mrb[7].mxu0 }
 0x2e3   :  { %v466_v47 = vpack.c.bf16 %v404_v45, %v401_v44 }
 0x2e5   :  { %467 = vst [vmem:[#allocation11] sm:$0xff] %v466_v47  }
 0x2e6   :  { %664 = shalt.err (!%p661_p8)
}
 0x2e7   :  { %s665_s11 = scalar_lea.hbm %s861_s7, 128 }
 0x2e8   :  { %p666_p9 = scmp.ne.s32.totalorder %s861_s7, %s665_s11  ;;  %p669_p10 = scmp.lt.u32.totalorder %s665_s11, %s861_s7 }
 0x2ea   :  { %p671_p11 = pnand %p669_p10, %p666_p9 }
 0x2ec   :  { %674 = shalt.err (!%p671_p11)
}
 0x2ed   :  { %428 = dma.vmem_to_hbm [thread:$0]  %s423_s9, 128, %s861_s7, [#allocation5], %s685_s13, %s685_s13, %s686_s14  }
 0x2ee   :  { %681 = dma.done.wait [#allocation5], 128  }
 0x2ef   :  { %682 = vsyncadd [#allocation5], 4294967168 }
 0x2f0   :  { %432 = vsyncpa [#allocation4], 1 }
 0x2f1   :  { %433 = vsyncpa [#allocation7], 1 }
 0x2f2   :  { %434 = vsyncpa [#allocation10], 1 }
 0x2f3   :  { %435 = vsyncpa [#allocation5], 1 }

</bundles_post_ra>
